<compile_context>
chip_gen: v6e
topology: v6e:2x2x1
jax: 0.10.0
libtpu: 0.0.40
codegen_flags: <defaults>
</compile_context>

<pallas_src>
import functools

import jax
import jax.numpy as jnp
from jax import lax
from jax.experimental import pallas as pl
from jax.experimental.pallas import tpu as pltpu


def _mhsa_kernel(x_ref, wqkv_ref, w0t_ref, o_ref, qkv_sc, *,
                 heads, dim_head, q_tile, seq_len):
    """One grid step = one (batch, query-tile).

    x_ref    : (1, T, D)         full sequence of the current batch element
    wqkv_ref : (D, 3*H*Dh) bf16  fused QKV weights, columns [Q | K | V], Q pre-scaled
    w0t_ref  : (H*Dh, D)   bf16  W_0^T (output projection needs no transpose)
    o_ref    : (1, Tq, D)        output tile (written exactly once)
    qkv_sc   : (T, 3*H*Dh) bf16  VMEM scratch holding the fused QKV activations
    """
    qt = pl.program_id(1)
    dh = dim_head
    hd = heads * dh
    cd = jnp.bfloat16  # MXU operand dtype; accumulation stays f32

    @pl.when(qt == 0)
    def _():
        # Fused QKV projection for the whole sequence, ONCE per batch element.
        x_all = x_ref[0].astype(cd)                                     # (T, D)
        qkv = lax.dot_general(x_all, wqkv_ref[...], (((1,), (0,)), ((), ())),
                              preferred_element_type=jnp.float32)       # (T, 3*hd)
        qkv_sc[...] = qkv.astype(cd)

    q_start = pl.multiple_of(qt * q_tile, q_tile)

    # TODO(synk): for very long T, switch to flash-style KV tiling with online softmax
    # so the (Tq, T) score tile is bounded; here T is assumed to fit in VMEM.
    ctx = []
    for h in range(heads):                                              # static unroll
        q_h = qkv_sc[pl.ds(q_start, q_tile), h * dh:(h + 1) * dh]       # (Tq, dh) pre-scaled
        k_h = qkv_sc[:, hd + h * dh:hd + (h + 1) * dh]                  # (T, dh)
        v_h = qkv_sc[:, 2 * hd + h * dh:2 * hd + (h + 1) * dh]          # (T, dh)

        # Scores: contract the head dims directly -- no in-kernel transpose.
        s = lax.dot_general(q_h, k_h, (((1,), (1,)), ((), ())),
                            preferred_element_type=jnp.float32)         # (Tq, T)
        # TODO(synk): optional boolean attention mask (masked_fill -inf) not wired;
        # this forward corresponds to mask=None.
        s = s - jnp.max(s, axis=-1, keepdims=True)
        p = jnp.exp(s)                                                  # f32 element-wise
        p = p * pl.reciprocal(jnp.sum(p, axis=-1, keepdims=True), approx=True)

        ctx.append(jnp.dot(p.astype(cd), v_h,
                           preferred_element_type=jnp.float32))         # (Tq, dh)

    # Concatenate per-head contexts in '(h d)' order -> one wide output projection.
    o_all = jnp.concatenate(ctx, axis=-1).astype(cd)                    # (Tq, hd)
    y = jnp.dot(o_all, w0t_ref[...], preferred_element_type=jnp.float32)  # (Tq, D)
    o_ref[0] = y.astype(o_ref.dtype)


def mhsa_pallas(x, w_qkv, w_0, heads, dim_head, q_tile=None):
    """x: (B, T, D) f32; w_qkv: (3*heads*dim_head, D); w_0: (D, heads*dim_head)."""
    B, T, D = x.shape
    dh = dim_head
    hd = heads * dh
    scale = float(dh) ** -0.5

    # Reproduce the 'b t (d k h)' fused-row layout with reshape/transpose (no gather):
    # row j = d*(3*H) + which*H + h  ->  column c = which*(H*Dh) + h*Dh + d.
    w = w_qkv.reshape(dh, 3, heads, D)                                  # (d, which, h, D)
    wqkv_fused = jnp.transpose(w, (3, 1, 2, 0)).reshape(D, 3 * hd)      # (D, 3*H*Dh)
    # Fold the softmax scale into the Q columns (done once, outside the kernel).
    wqkv_fused = jnp.concatenate(
        [wqkv_fused[:, :hd] * scale, wqkv_fused[:, hd:]], axis=1)
    w0t = w_0.T                                                         # (H*Dh, D)

    # MXU operands in bf16 (done once here, not per grid step).
    wqkv_fused = wqkv_fused.astype(jnp.bfloat16)
    w0t = w0t.astype(jnp.bfloat16)

    # Query tiling bounds the (Tq, T) score tile; K/V (the QKV scratch) are computed
    # once per batch element regardless of the number of query tiles.
    if q_tile is None:
        q_tile = T if T <= 512 else next((t for t in (512, 256, 128) if T % t == 0), T)
    assert T % q_tile == 0, "q_tile must divide T"
    n_qt = T // q_tile

    # Rough VMEM budget (double-buffered inputs/outputs + scratch + score tile);
    # raise the scoped limit only if it exceeds the default, capped at 64 MiB (v7x).
    est = (2 * T * D * 4                 # x block
           + 2 * D * 3 * hd * 2          # fused QKV weights
           + 2 * hd * D * 2              # W_0^T
           + 2 * q_tile * D * 4          # output tile
           + T * 3 * hd * 2              # QKV scratch
           + 2 * q_tile * T * 4          # score tile + exp
           + 2 * q_tile * hd * 4)        # context
    vmem_limit = None
    if est > 32 * 1024 * 1024:
        vmem_limit = min(int(est * 1.3), 64 * 1024 * 1024)

    kernel = functools.partial(_mhsa_kernel, heads=heads, dim_head=dh,
                               q_tile=q_tile, seq_len=T)

    return pl.pallas_call(
        kernel,
        out_shape=jax.ShapeDtypeStruct((B, T, D), x.dtype),
        grid_spec=pltpu.PrefetchScalarGridSpec(
            num_scalar_prefetch=0,
            grid=(B, n_qt),
            in_specs=[
                # x: full sequence per batch; index_map independent of qt, so the
                # block is only re-DMA'd when the batch index changes.
                pl.BlockSpec((1, T, D), lambda b, qt: (b, 0, 0)),
                pl.BlockSpec((D, 3 * hd), lambda b, qt: (0, 0)),   # fused QKV weights
                pl.BlockSpec((hd, D), lambda b, qt: (0, 0)),       # W_0^T
            ],
            out_specs=pl.BlockSpec((1, q_tile, D), lambda b, qt: (b, qt, 0)),
            scratch_shapes=[pltpu.VMEM((T, 3 * hd), jnp.bfloat16)],
        ),
        compiler_params=pltpu.CompilerParams(
            # batch axis is independent (megacore); query-tile axis carries the
            # per-batch QKV scratch, so it must stay sequential.
            dimension_semantics=("parallel", "arbitrary"),
            vmem_limit_bytes=vmem_limit,
        ),
    )(x, wqkv_fused, w0t)


def mhsa_reference(x, w_qkv, w_0, heads, dim_head):
    """Pure-JAX f32 reference matching the PyTorch forward exactly (mask=None)."""
    B, T, D = x.shape
    dh = dim_head
    scale = float(dh) ** -0.5
    qkv = jnp.einsum("btd,od->bto", x, w_qkv)                     # (B, T, 3*H*Dh)
    qkv = qkv.reshape(B, T, dh, 3, heads)                         # 'b t (d k h)'
    qkv = jnp.transpose(qkv, (3, 0, 4, 1, 2))                     # (3, B, H, T, Dh)
    q, k, v = qkv[0], qkv[1], qkv[2]
    s = jnp.einsum("bhid,bhjd->bhij", q, k) * scale
    p = jax.nn.softmax(s, axis=-1)
    o = jnp.einsum("bhij,bhjd->bhid", p, v)                       # (B, H, T, Dh)
    o = jnp.transpose(o, (0, 2, 1, 3)).reshape(B, T, heads * dh)  # 'b h t d -> b t (h d)'
    return jnp.einsum("bte,de->btd", o, w_0)


if __name__ == "__main__":
    # Small shapes: batch=2, seq=8, dim=32, heads=4 -> dim_head=8, _dim=32.
    B, T, DIM, HEADS = 2, 8, 32, 4
    DIM_HEAD = DIM // HEADS
    _DIM = DIM_HEAD * HEADS

    key = jax.random.PRNGKey(0)
    kx, kqkv, kw0 = jax.random.split(key, 3)
    x = jax.random.normal(kx, (B, T, DIM), dtype=jnp.float32)
    # nn.Linear(dim, _dim*3, bias=False).weight has shape (_dim*3, dim)
    w_qkv = jax.random.normal(kqkv, (_DIM * 3, DIM), dtype=jnp.float32) * (DIM ** -0.5)
    # nn.Linear(_dim, dim, bias=False).weight has shape (dim, _dim)
    w_0 = jax.random.normal(kw0, (DIM, _DIM), dtype=jnp.float32) * (_DIM ** -0.5)

    out = mhsa_pallas(x, w_qkv, w_0, HEADS, DIM_HEAD)
    out = jax.block_until_ready(out)

    ref = mhsa_reference(x, w_qkv, w_0, HEADS, DIM_HEAD)
    # bf16 MXU operands + approx reciprocal loosen the tolerance vs the pure-f32 reference.
    assert jnp.allclose(out, ref, atol=5e-2, rtol=5e-2), "mismatch vs reference"

    print("KERNEL_OK")
</pallas_src>

<mosaic_0001>
module attributes {stable_mosaic.version = 11 : i64} {
  func.func @_mhsa_kernel(%arg0: i32, %arg1: i32, %arg2: memref<1x8x32xf32, #tpu.memory_space<vmem>>, %arg3: memref<32x96xbf16, #tpu.memory_space<vmem>>, %arg4: memref<32x32xbf16, #tpu.memory_space<vmem>>, %arg5: memref<1x8x32xf32, #tpu.memory_space<vmem>>, %arg6: memref<8x96xbf16, #tpu.memory_space<vmem>>) attributes {dimension_semantics = [#tpu.dimension_semantics<parallel>, #tpu.dimension_semantics<arbitrary>], iteration_bounds = array<i64: 2, 1>, scalar_prefetch = 0 : i64, scratch_operands = 1 : i64, tpu.core_type = #tpu.core_type<tc>, window_params = [{transform_indices = @transform_0, window_bounds = array<i64: 1, 8, 32>}, {pipeline_mode = #tpu.pipeline_mode<synchronous>, transform_indices = @transform_1, window_bounds = array<i64: 32, 96>}, {pipeline_mode = #tpu.pipeline_mode<synchronous>, transform_indices = @transform_2, window_bounds = array<i64: 32, 32>}, {transform_indices = @transform_3, window_bounds = array<i64: 1, 8, 32>}]} {
    %c0_i32 = arith.constant 0 : i32
    %0 = arith.cmpi eq, %arg1, %c0_i32 : i32
    %1 = arith.extui %0 : i1 to i32
    %c0_i32_0 = arith.constant 0 : i32
    %2 = arith.cmpi ne, %1, %c0_i32_0 : i32
    scf.if %2 {
      %c0_30 = arith.constant 0 : index
      %c0_31 = arith.constant 0 : index
      %c0_32 = arith.constant 0 : index
      %80 = vector.load %arg2[%c0_30, %c0_31, %c0_32] : memref<1x8x32xf32, #tpu.memory_space<vmem>>, vector<1x8x32xf32>
      %81 = vector.shape_cast %80 : vector<1x8x32xf32> to vector<8x32xf32>
      %82 = arith.truncf %81 : vector<8x32xf32> to vector<8x32xbf16>
      %c0_33 = arith.constant 0 : index
      %c0_34 = arith.constant 0 : index
      %83 = vector.load %arg3[%c0_33, %c0_34] : memref<32x96xbf16, #tpu.memory_space<vmem>>, vector<32x96xbf16>
      %cst_35 = arith.constant dense<0.000000e+00> : vector<8x96xf32>
      %84 = tpu.matmul %82, %83, %cst_35 {dimension_numbers = #tpu.dot_dimension_numbers<[1], [0], [0], [1], [0, 0, 1, 1], [], []>} : vector<8x32xbf16>, vector<32x96xbf16>, vector<8x96xf32> -> vector<8x96xf32>
      %85 = arith.truncf %84 : vector<8x96xf32> to vector<8x96xbf16>
      %c0_36 = arith.constant 0 : index
      %c0_37 = arith.constant 0 : index
      %86 = vector.load %arg6[%c0_36, %c0_37] : memref<8x96xbf16, #tpu.memory_space<vmem>>, vector<8x96xbf16>
      tpu.vector_store %arg6[%c0_36, %c0_37], %85 {strides = array<i32>} : memref<8x96xbf16, #tpu.memory_space<vmem>>, vector<8x96xbf16>,
    } else {
    }
    %c8_i32 = arith.constant 8 : i32
    %3 = arith.muli %arg1, %c8_i32 : i32
    %4 = tpu.assume_multiple %3, 8 : i32
    %5 = arith.index_cast %4 : i32 to index
    %c0 = arith.constant 0 : index
    %6 = vector.load %arg6[%5, %c0] : memref<8x96xbf16, #tpu.memory_space<vmem>>, vector<8x8xbf16>
    %c0_1 = arith.constant 0 : index
    %c32 = arith.constant 32 : index
    %7 = vector.load %arg6[%c0_1, %c32] : memref<8x96xbf16, #tpu.memory_space<vmem>>, vector<8x8xbf16>
    %c0_2 = arith.constant 0 : index
    %c64 = arith.constant 64 : index
    %8 = vector.load %arg6[%c0_2, %c64] : memref<8x96xbf16, #tpu.memory_space<vmem>>, vector<8x8xbf16>
    %cst = arith.constant dense<0.000000e+00> : vector<8x8xf32>
    %9 = tpu.matmul %6, %7, %cst {dimension_numbers = #tpu.dot_dimension_numbers<[1], [1], [0], [0], [0, 0, 1, 0], [], []>} : vector<8x8xbf16>, vector<8x8xbf16>, vector<8x8xf32> -> vector<8x8xf32>
    %cst_3 = arith.constant dense<0xFF800000> : vector<8xf32>
    %10 = vector.multi_reduction <maximumf>, %9, %cst_3 [1] : vector<8x8xf32> to vector<8xf32>
    %11 = vector.shape_cast %10 : vector<8xf32> to vector<8x1xf32>
    %12 = vector.broadcast %11 : vector<8x1xf32> to vector<8x8xf32>
    %13 = arith.subf %9, %12 : vector<8x8xf32>
    %14 = math.exp %13 : vector<8x8xf32>
    %cst_4 = arith.constant dense<0.000000e+00> : vector<8xf32>
    %15 = vector.multi_reduction <add>, %14, %cst_4 [1] : vector<8x8xf32> to vector<8xf32>
    %16 = vector.shape_cast %15 : vector<8xf32> to vector<8x1xf32>
    %17 = tpu.reciprocal %16 {approx = true} : vector<8x1xf32> -> vector<8x1xf32>
    %18 = vector.broadcast %17 : vector<8x1xf32> to vector<8x8xf32>
    %19 = arith.mulf %14, %18 : vector<8x8xf32>
    %20 = arith.truncf %19 : vector<8x8xf32> to vector<8x8xbf16>
    %cst_5 = arith.constant dense<0.000000e+00> : vector<8x8xf32>
    %21 = tpu.matmul %20, %8, %cst_5 {dimension_numbers = #tpu.dot_dimension_numbers<[1], [0], [0], [1], [0, 0, 1, 1], [], []>} : vector<8x8xbf16>, vector<8x8xbf16>, vector<8x8xf32> -> vector<8x8xf32>
    %22 = arith.index_cast %4 : i32 to index
    %c8 = arith.constant 8 : index
    %23 = vector.load %arg6[%22, %c8] : memref<8x96xbf16, #tpu.memory_space<vmem>>, vector<8x8xbf16>
    %c0_6 = arith.constant 0 : index
    %c40 = arith.constant 40 : index
    %24 = vector.load %arg6[%c0_6, %c40] : memref<8x96xbf16, #tpu.memory_space<vmem>>, vector<8x8xbf16>
    %c0_7 = arith.constant 0 : index
    %c72 = arith.constant 72 : index
    %25 = vector.load %arg6[%c0_7, %c72] : memref<8x96xbf16, #tpu.memory_space<vmem>>, vector<8x8xbf16>
    %cst_8 = arith.constant dense<0.000000e+00> : vector<8x8xf32>
    %26 = tpu.matmul %23, %24, %cst_8 {dimension_numbers = #tpu.dot_dimension_numbers<[1], [1], [0], [0], [0, 0, 1, 0], [], []>} : vector<8x8xbf16>, vector<8x8xbf16>, vector<8x8xf32> -> vector<8x8xf32>
    %cst_9 = arith.constant dense<0xFF800000> : vector<8xf32>
    %27 = vector.multi_reduction <maximumf>, %26, %cst_9 [1] : vector<8x8xf32> to vector<8xf32>
    %28 = vector.shape_cast %27 : vector<8xf32> to vector<8x1xf32>
    %29 = vector.broadcast %28 : vector<8x1xf32> to vector<8x8xf32>
    %30 = arith.subf %26, %29 : vector<8x8xf32>
    %31 = math.exp %30 : vector<8x8xf32>
    %cst_10 = arith.constant dense<0.000000e+00> : vector<8xf32>
    %32 = vector.multi_reduction <add>, %31, %cst_10 [1] : vector<8x8xf32> to vector<8xf32>
    %33 = vector.shape_cast %32 : vector<8xf32> to vector<8x1xf32>
    %34 = tpu.reciprocal %33 {approx = true} : vector<8x1xf32> -> vector<8x1xf32>
    %35 = vector.broadcast %34 : vector<8x1xf32> to vector<8x8xf32>
    %36 = arith.mulf %31, %35 : vector<8x8xf32>
    %37 = arith.truncf %36 : vector<8x8xf32> to vector<8x8xbf16>
    %cst_11 = arith.constant dense<0.000000e+00> : vector<8x8xf32>
    %38 = tpu.matmul %37, %25, %cst_11 {dimension_numbers = #tpu.dot_dimension_numbers<[1], [0], [0], [1], [0, 0, 1, 1], [], []>} : vector<8x8xbf16>, vector<8x8xbf16>, vector<8x8xf32> -> vector<8x8xf32>
    %39 = arith.index_cast %4 : i32 to index
    %c16 = arith.constant 16 : index
    %40 = vector.load %arg6[%39, %c16] : memref<8x96xbf16, #tpu.memory_space<vmem>>, vector<8x8xbf16>
    %c0_12 = arith.constant 0 : index
    %c48 = arith.constant 48 : index
    %41 = vector.load %arg6[%c0_12, %c48] : memref<8x96xbf16, #tpu.memory_space<vmem>>, vector<8x8xbf16>
    %c0_13 = arith.constant 0 : index
    %c80 = arith.constant 80 : index
    %42 = vector.load %arg6[%c0_13, %c80] : memref<8x96xbf16, #tpu.memory_space<vmem>>, vector<8x8xbf16>
    %cst_14 = arith.constant dense<0.000000e+00> : vector<8x8xf32>
    %43 = tpu.matmul %40, %41, %cst_14 {dimension_numbers = #tpu.dot_dimension_numbers<[1], [1], [0], [0], [0, 0, 1, 0], [], []>} : vector<8x8xbf16>, vector<8x8xbf16>, vector<8x8xf32> -> vector<8x8xf32>
    %cst_15 = arith.constant dense<0xFF800000> : vector<8xf32>
    %44 = vector.multi_reduction <maximumf>, %43, %cst_15 [1] : vector<8x8xf32> to vector<8xf32>
    %45 = vector.shape_cast %44 : vector<8xf32> to vector<8x1xf32>
    %46 = vector.broadcast %45 : vector<8x1xf32> to vector<8x8xf32>
    %47 = arith.subf %43, %46 : vector<8x8xf32>
    %48 = math.exp %47 : vector<8x8xf32>
    %cst_16 = arith.constant dense<0.000000e+00> : vector<8xf32>
    %49 = vector.multi_reduction <add>, %48, %cst_16 [1] : vector<8x8xf32> to vector<8xf32>
    %50 = vector.shape_cast %49 : vector<8xf32> to vector<8x1xf32>
    %51 = tpu.reciprocal %50 {approx = true} : vector<8x1xf32> -> vector<8x1xf32>
    %52 = vector.broadcast %51 : vector<8x1xf32> to vector<8x8xf32>
    %53 = arith.mulf %48, %52 : vector<8x8xf32>
    %54 = arith.truncf %53 : vector<8x8xf32> to vector<8x8xbf16>
    %cst_17 = arith.constant dense<0.000000e+00> : vector<8x8xf32>
    %55 = tpu.matmul %54, %42, %cst_17 {dimension_numbers = #tpu.dot_dimension_numbers<[1], [0], [0], [1], [0, 0, 1, 1], [], []>} : vector<8x8xbf16>, vector<8x8xbf16>, vector<8x8xf32> -> vector<8x8xf32>
    %56 = arith.index_cast %4 : i32 to index
    %c24 = arith.constant 24 : index
    %57 = vector.load %arg6[%56, %c24] : memref<8x96xbf16, #tpu.memory_space<vmem>>, vector<8x8xbf16>
    %c0_18 = arith.constant 0 : index
    %c56 = arith.constant 56 : index
    %58 = vector.load %arg6[%c0_18, %c56] : memref<8x96xbf16, #tpu.memory_space<vmem>>, vector<8x8xbf16>
    %c0_19 = arith.constant 0 : index
    %c88 = arith.constant 88 : index
    %59 = vector.load %arg6[%c0_19, %c88] : memref<8x96xbf16, #tpu.memory_space<vmem>>, vector<8x8xbf16>
    %cst_20 = arith.constant dense<0.000000e+00> : vector<8x8xf32>
    %60 = tpu.matmul %57, %58, %cst_20 {dimension_numbers = #tpu.dot_dimension_numbers<[1], [1], [0], [0], [0, 0, 1, 0], [], []>} : vector<8x8xbf16>, vector<8x8xbf16>, vector<8x8xf32> -> vector<8x8xf32>
    %cst_21 = arith.constant dense<0xFF800000> : vector<8xf32>
    %61 = vector.multi_reduction <maximumf>, %60, %cst_21 [1] : vector<8x8xf32> to vector<8xf32>
    %62 = vector.shape_cast %61 : vector<8xf32> to vector<8x1xf32>
    %63 = vector.broadcast %62 : vector<8x1xf32> to vector<8x8xf32>
    %64 = arith.subf %60, %63 : vector<8x8xf32>
    %65 = math.exp %64 : vector<8x8xf32>
    %cst_22 = arith.constant dense<0.000000e+00> : vector<8xf32>
    %66 = vector.multi_reduction <add>, %65, %cst_22 [1] : vector<8x8xf32> to vector<8xf32>
    %67 = vector.shape_cast %66 : vector<8xf32> to vector<8x1xf32>
    %68 = tpu.reciprocal %67 {approx = true} : vector<8x1xf32> -> vector<8x1xf32>
    %69 = vector.broadcast %68 : vector<8x1xf32> to vector<8x8xf32>
    %70 = arith.mulf %65, %69 : vector<8x8xf32>
    %71 = arith.truncf %70 : vector<8x8xf32> to vector<8x8xbf16>
    %cst_23 = arith.constant dense<0.000000e+00> : vector<8x8xf32>
    %72 = tpu.matmul %71, %59, %cst_23 {dimension_numbers = #tpu.dot_dimension_numbers<[1], [0], [0], [1], [0, 0, 1, 1], [], []>} : vector<8x8xbf16>, vector<8x8xbf16>, vector<8x8xf32> -> vector<8x8xf32>
    %73 = tpu.concatenate %21, %38, %55, %72 in 1 : vector<8x8xf32>, vector<8x8xf32>, vector<8x8xf32>, vector<8x8xf32> -> vector<8x32xf32>
    %74 = arith.truncf %73 : vector<8x32xf32> to vector<8x32xbf16>
    %c0_24 = arith.constant 0 : index
    %c0_25 = arith.constant 0 : index
    %75 = vector.load %arg4[%c0_24, %c0_25] : memref<32x32xbf16, #tpu.memory_space<vmem>>, vector<32x32xbf16>
    %cst_26 = arith.constant dense<0.000000e+00> : vector<8x32xf32>
    %76 = tpu.matmul %74, %75, %cst_26 {dimension_numbers = #tpu.dot_dimension_numbers<[1], [0], [0], [1], [0, 0, 1, 1], [], []>} : vector<8x32xbf16>, vector<32x32xbf16>, vector<8x32xf32> -> vector<8x32xf32>
    %c0_27 = arith.constant 0 : index
    %c0_28 = arith.constant 0 : index
    %c0_29 = arith.constant 0 : index
    %77 = vector.load %arg5[%c0_27, %c0_28, %c0_29] : memref<1x8x32xf32, #tpu.memory_space<vmem>>, vector<1x8x32xf32>
    %78 = vector.shape_cast %77 : vector<1x8x32xf32> to vector<8x32xf32>
    %79 = vector.shape_cast %76 : vector<8x32xf32> to vector<1x8x32xf32>
    tpu.vector_store %arg5[%c0_27, %c0_28, %c0_29], %79 {strides = array<i32>} : memref<1x8x32xf32, #tpu.memory_space<vmem>>, vector<1x8x32xf32>,
    return
  }
  func.func @transform_0(%arg0: i32, %arg1: i32) -> (i32, i32, i32) {
    %c0_i32 = arith.constant 0 : i32
    %c0_i32_0 = arith.constant 0 : i32
    %c0_i32_1 = arith.constant 0 : i32
    return %arg0, %c0_i32, %c0_i32_0 : i32, i32, i32
  }
  func.func @transform_1(%arg0: i32, %arg1: i32) -> (i32, i32) {
    %c0_i32 = arith.constant 0 : i32
    %c0_i32_0 = arith.constant 0 : i32
    %c0_i32_1 = arith.constant 0 : i32
    return %c0_i32, %c0_i32_0 : i32, i32
  }
  func.func @transform_2(%arg0: i32, %arg1: i32) -> (i32, i32) {
    %c0_i32 = arith.constant 0 : i32
    %c0_i32_0 = arith.constant 0 : i32
    %c0_i32_1 = arith.constant 0 : i32
    return %c0_i32, %c0_i32_0 : i32, i32
  }
  func.func @transform_3(%arg0: i32, %arg1: i32) -> (i32, i32, i32) {
    %c0_i32 = arith.constant 0 : i32
    %c0_i32_0 = arith.constant 0 : i32
    return %arg0, %arg1, %c0_i32 : i32, i32, i32
  }
}

</mosaic_0001>

<bundles_post_ra>
// kernel: tpu_custom_call.1
= control target key start
LH: loop header
LB: loop body
LE: loop exit
PB: predicated region body
PF: predicated region fallthrough
CT: control target
= control target key end

     0   :  { %8 = vsyncpa [#allocation4], 0  ;;  %s1656_s0 = inlined_call_operand.hbm [shape: f32[2,8,32], index: 0, kind: input, shape index: {}]   ;;  %s1657_s1 = inlined_call_operand.hbm [shape: bf16[32,96], index: 1, kind: input, shape index: {}]   ;;  %s1658_s2 = inlined_call_operand.hbm [shape: bf16[32,32], index: 2, kind: input, shape index: {}]   ;;  %s1659_s3 = inlined_call_operand.hbm [shape: f32[2,8,32], index: 3, kind: output, shape index: {}]  }
   0x1   :  { %10 = vsyncpa [#allocation4 + $0x1], 0 }
   0x2   :  { %11 = vsyncpa [#allocation7], 0 }
   0x3   :  { %12 = vsyncpa [#allocation5], 0 }
   0x4   :  { %14 = vsyncpa [#allocation5 + $0x1], 0  ;;  %s1396_s12 = smov 0   ;;  %s1398_s13 = smov 0  }
   0x5   :  { %s1400_s14 = smov 0   ;;  %s1402_s15 = smov 0  }
   0x6   :  { %s1404_s16 = smov 0   ;;  %s1406_s17 = smov 0  }
   0x7 LB: > { %s946_s18 = sadd.s32 4294967295, %s1352_s17   ;;  %s947_s19 = sadd.s32 4294967294, %s1352_s17   ;;  %s1352_s17 = sphi %s1406_s17, %s20_s17   ;;  %s1348_s16 = sphi %s1404_s16, %s1679_s16   ;;  %s1344_s15 = sphi %s1402_s15, %s1678_s15   ;;  %s1340_s14 = sphi %s1400_s14, %s1677_s14   ;;  %s1336_s13 = sphi %s1398_s13, %s1676_s13   ;;  %s1332_s12 = sphi %s1396_s12, %s1675_s12  }
   0x8   : > { %p52_p0 = scmp.ne.s32.totalorder %s1336_s13, %s1332_s12  ;;  %p1430_p1 = scmp.eq.s32.totalorder %s946_s18, 0 }
   0x9   : > { %p1434_p2 = scmp.eq.s32.totalorder %s946_s18, 1  ;;  %p126_p3 = scmp.eq.s32.totalorder %s947_s19, 1 }
   0xa   : > { %s1663_s20 = scalar_select %p1430_p1, 1, 0 }
   0xb   : > { %p1440_p4 = por %p1430_p1, %p52_p0  ;;  %p948_p5 = scmp.ge.s32.totalorder %s1352_s17, 1 }
   0xc   : > { %p1445_p6 = por %p126_p3, %p52_p0  ;;  %p133_p7 = scmp.lt.s32.totalorder %s1352_s17, 3 }
   0xd   : > { %s1665_s22 = scalar_select %p1440_p4, 1, 0 }
   0xe   : > { %s1666_s23 = scalar_select %p1445_p6, 1, 0 }
   0xf   : > { %p1450_p8 = pnand %p948_p5, %p133_p7  ;;  %s1354_s25 = smov [#allocation6]  }
  0x10   : > { %s145_s26 = sshll.u32 %s1354_s25, 4  ;;  %s1355_s28 = smov [#allocation8]   ;;  %s146_s26 = int_to_ptr.vmem [resolvable:$true] %s145_s26 }
  0x11   : > { %p1077_p9 = pneg %p1450_p8  ;;  %s158_s29 = sshll.u32 %s1355_s28, 4  ;;  %s159_s29 = int_to_ptr.vmem [resolvable:$true] %s158_s29 }
  0x12   : > { %s1199_s30 = scalar_lea.vmem %s146_s26, 256  ;;  %p1207_p5 = scmp.lt.s32.totalorder %s146_s26, %s146_s26 }
  0x13   : > { %p1459_p11 = pnand %p1077_p9, %p1430_p1  ;;  %p1200_p13 = scmp.ne.s32.totalorder %s146_s26, %s1199_s30 }
  0x14   : > { %p1208_p7 = scmp.lt.s32.totalorder %s1199_s30, %s1199_s30 }
  0x15   : > { %p1190_p12 = pneg %p1459_p11 }
  0x16   : > { %p1209_p10 = por %p1208_p7, %p1207_p5 }
  0x17   : > { %p1202_p0 = pnand %p1200_p13, %p1190_p12 }
  0x19   : > { %p1203_p3 = pneg %p1202_p0 }
  0x1b   : > { %p1210_p9 = pnand %p1209_p10, %p1203_p3 }
  0x1d   : > { %1213 = shalt.err (!%p1210_p9)
}
  0x1e   : > { %s1356_s4 = smov 64   ;;  %s1357_s5 = smov 4  }
  0x1f   : > { %1080 = dma.hbm_to_vmem [thread:$0]  (!%p1459_p11), %s1657_s1, 256, %s146_s26, [#allocation7], %s1356_s4, %s1356_s4, %s1357_s5  }
  0x20   : > { %s1225_s8 = scalar_lea.vmem %s159_s29, 256  ;;  %p1233_p1 = scmp.lt.s32.totalorder %s159_s29, %s159_s29 }
  0x21   : > { %p1226_p6 = scmp.ne.s32.totalorder %s159_s29, %s1225_s8  ;;  %p1234_p4 = scmp.lt.s32.totalorder %s1225_s8, %s1225_s8 }
  0x23   : > { %p1228_p13 = pnand %p1226_p6, %p1190_p12  ;;  %p1235_p5 = por %p1234_p4, %p1233_p1 }
  0x25   : > { %p1229_p0 = pneg %p1228_p13 }
  0x27   : > { %p1236_p10 = pnand %p1235_p5, %p1229_p0 }
  0x29   : > { %1239 = shalt.err (!%p1236_p10)
}
  0x2a   : > { %1083 = dma.hbm_to_vmem [thread:$0]  (!%p1459_p11), %s1658_s2, 256, %s159_s29, [#allocation7], %s1356_s4, %s1356_s4, %s1357_s5  }
  0x2b   : > { %s32_s11 = sadd.s32 1, %s1348_s16  ;;  %s39_s18 = sadd.s32 1, %s1340_s14 }
  0x2c   : > { %p34_p1 = scmp.ge.s32.totalorder %s32_s11, 2  ;;  %p46_p4 = scmp.ne.s32.totalorder %s1340_s14, %s1336_s13 }
  0x2d   : > { %p47_p6 = scmp.eq.s32.totalorder %s1352_s17, 0  ;;  %p1094_p12 = scmp.lt.s32.totalorder %s1352_s17, 2 }
  0x2e   : > { %s1681_s11 = smov (%p34_p1, %s32_s11), 0  ;;  %p1491_p7 = por %p1434_p2, %p46_p4 }
  0x2f   : > { %p48_p3 = por %p47_p6, %p46_p4  ;;  %s36_s25 = ssub.s32 %s1348_s16, %s1681_s11 }
  0x30   : > { %s172_s26 = sand.u32 1, %s1340_s14   ;;  %p37_p9 = scmp.eq.s32.totalorder %s36_s25, 0 }
  0x31   : > { %s952_s27 = sshll.u32 %s172_s26, 3  ;;  %s953_s28 = sshll.u32 %s1348_s16, 7 }
  0x32   : > { %s1500_s29 = scalar_select %p37_p9, %s1340_s14, %s39_s18  }
  0x33   : > { %s181_s5 = scalar_lea.hbm %s1656_s0, %s953_s28  ;;  %s176_s6 = scalar_lea.vmem [#allocation3], %s952_s27 }
  0x34   : > { %s183_s7 = sshll.u32 %s176_s6, 4  ;;  %p1507_p11 = pnand %p1094_p12, %p48_p3  ;;  %s184_s7 = int_to_ptr.vmem [resolvable:$true] %s183_s7 }
  0x35   : > { %s173_s8 = scalar_lea.sflag [#allocation4], %s172_s26  ;;  %s1253_s9 = scalar_lea.vmem %s184_s7, 128 }
  0x36   : > { %p1242_p2 = pneg %p1507_p11  ;;  %p1254_p13 = scmp.ne.s32.totalorder %s184_s7, %s1253_s9 }
  0x37   : > { %s1358_s10 = smov [#allocation3]  }
  0x38   : > { %p1256_p0 = pnand %p1254_p13, %p1242_p2  ;;  %s1258_s18 = sshll.u32 %s1358_s10, 4  ;;  %s1259_s18 = int_to_ptr.vmem [resolvable:$false] %s1258_s18 }
  0x39   : > { %s1260_s25 = scalar_lea.vmem %s1259_s18, 256  ;;  %p1261_p10 = scmp.lt.s32.totalorder %s184_s7, %s1259_s18 }
  0x3a   : > { %p1257_p5 = pneg %p1256_p0  ;;  %p1262_p1 = scmp.lt.s32.totalorder %s1260_s25, %s1253_s9 }
  0x3c   : > { %p1263_p4 = por %p1262_p1, %p1261_p10 }
  0x3e   : > { %p1264_p6 = pnand %p1263_p4, %p1257_p5 }
  0x40   : > { %1267 = shalt.err (!%p1264_p6)
}
  0x41   : > { %1087 = dma.hbm_to_vmem [thread:$0]  (!%p1507_p11), %s181_s5, 128, %s184_s7, %s173_s8  }
  0x42   : > { %192 = sbr.rel (%p1450_p8) target bundleno = 1499 (0x5db), region = 32  ;;  %s1518_s26 = sand.u32 (!%p1450_p8), 1, %s1336_s13  }
  0x43   : > { %s955_s27 = sshll.u32 (!%p1450_p8), %s1518_s26, 3  ;;  %s195_s28 = scalar_lea.sflag (!%p1450_p8), [#allocation4], %s1518_s26 }
  0x44   : > { %s198_s30 = scalar_lea.vmem (!%p1450_p8), [#allocation3], %s955_s27  ;;  %p1671_p12 = scmp.ne.s32.totalorder (!%p1450_p8), %s1665_s22, 0 }
  0x47   : > { %1319 = dma.done.wait (%p1671_p12), %s195_s28, 128  }
  0x48   : > { %1321 = vsyncadd (%p1671_p12), %s195_s28, 4294967168  ;;  %p1672_p3 = scmp.ne.s32.totalorder %s1663_s20, 0 }
  0x4a   : > { %1323 = dma.done.wait (%p1672_p3), [#allocation7], 512  }
  0x4b   : > { %1325 = vsyncadd (%p1672_p3), [#allocation7], 4294966784  ;;  %v1359_v0 = vmov 0.0   ;;  %vm1360_vm0 = vmmov 0   ;;  %v1166_v1 = vld [vmem:[#allocation6 + $0x8] sm:$0xff]   ;;  %v1167_v2 = vld [vmem:[#allocation6] sm:$0xff]  }
  0x4c   : > { %1001 = vmatprep.subr.bf16.mxu0 %v1359_v0  ;;  %1005 = vmatprep.mubr.msk.bf16.mxu0 %vm1360_vm0, %v1359_v0  ;;  %v234_v3 = vld [vmem:[%s198_s30] sm:$0xff]  ;;  %vm252_vm1 = vcmask 261120   ;;  %vm297_vm2 = vcmask 781312   ;;  %s1361_s20 = smov 96   ;;  %s1362_s22 = smov 120   ;;  %vm311_vm3 = vcmask 64512  }
  0x4d   : > { %1009 = vmatprep.subr.bf16.mxu1 %v1359_v0  ;;  %1011 = vmatprep.mubr.msk.bf16.mxu1 %vm1360_vm0, %v1359_v0  ;;  %v235_v4 = vpack.c.bf16 %v234_v3, %v234_v3  ;;  %s1363_s24 = smov 88   ;;  %s1364_s4 = smov 80   ;;  %vm375_vm4 = vcmask 1043456   ;;  %vm765_vm5 = vcmask 130048   ;;  %vm767_vm6 = vcmask 195584  }
  0x4e   : > { %1002 = vmatpush3.bf16.msra.mxu0 %v1166_v1  ;;  %s1365_s5 = smov 112   ;;  %s1366_s6 = smov 72  }
  0x4f   : > { %1003 = vmatprep.subr.bf16.mxu0 %v1359_v0  ;;  %s1367_s7 = smov 104   ;;  %s1368_s21 = smov 56  }
  0x50   : > { %s1369_s8 = smov 64   ;;  %s1370_s9 = smov 40  }
  0x51   : > { %s1371_s10 = smov 48   ;;  %s1372_s18 = smov 8  }
  0x52   : > { %1004 = vmatpush3.bf16.msra.mxu0 %v1167_v2  ;;  %s1373_s25 = smov 16   ;;  %s1374_s28 = smov 24  }
  0x53   : > { %1015 = vmatprep.subr.bf16.mxu0 %v1359_v0  ;;  %s976_s30 = sshll.u32 %s1344_s15, 7  ;;  %s1375_s15 = smov [#allocation9]  }
  0x55   : > { %1006 = vmatmul.mubr.msk.bf16.vlgmr.msra.gmra.mxu0 %vm252_vm1, %v235_v4 }
  0x56   : > { %1017 = vmatprep.mubr.msk.bf16.mxu0 %vm1360_vm0, %v1359_v0 }
 0x115   : > { %v290_v5 = vpop.f32.mrf.mxu0 }
 0x116   : > { %v296_v6 = vpack.c.bf16 %v290_v5, %v290_v5 }
 0x117   : > { %v1007_v7 = vpop.f32.mrf.mxu0 }
 0x118   : > { %298 = vst.msk [vmem:[#allocation2] sm:$0xf] %vm297_vm2, %v296_v6 }
 0x119   : > { %v293_v8 = vpop.f32.mrf.mxu0 }
 0x11b   : > { %v1008_v9 = vpop.f32.mrf.mxu0 }
 0x11f   : > { %v1543_v10 = vld [vmem:[#allocation2] ss:$0 sps:$4 sm:$0xff]  }
 0x120   : > { %v304_v11 = vld [vmem:[#allocation2] sm:$0xf]  ;;  %309 = vrot.lane.b32.xlu0 %v1543_v10, %s1361_s20  ;;  %s228_s20 = scalar_lea.vmem [#allocation9], %s955_s27  ;;  %s1272_s27 = sshll.u32 %s1375_s15, 4  ;;  %s1273_s27 = int_to_ptr.vmem [resolvable:$false] %s1272_s27 }
 0x121   : > { %v965_v12 = vcombine.low %v304_v11, %v304_v11 }
 0x123   : > { %422 = vrot.lane.b32.xlu1 %v965_v12, %s1362_s22  ;;  %s846_s22 = sshll.u32 %s228_s20, 4  ;;  %s1609_s22 = int_to_ptr.vmem [resolvable:$true] %s846_s22 }
 0x124   : > { %424 = vrot.lane.b32.xlu0 %v1543_v10, %s1363_s24  ;;  %p1275_p2 = scmp.lt.s32.totalorder %s1609_s22, %s1273_s27 }
 0x127   : > { %534 = vrot.lane.b32.xlu1 %v1543_v10, %s1364_s4 }
 0x128   : > { %532 = vrot.lane.b32.xlu0 %v965_v12, %s1365_s5  ;;  %s1607_s5 = scalar_lea.hbm %s1659_s3, %s976_s30 }
 0x12b   : > { %644 = vrot.lane.b32.xlu1 %v1543_v10, %s1366_s6  ;;  %s832_s6 = scalar_lea.sflag [#allocation5], %s1518_s26 }
 0x12c   : > { %642 = vrot.lane.b32.xlu0 %v965_v12, %s1367_s7  ;;  %s1268_s7 = scalar_lea.vmem %s1609_s22, 128 }
 0x12d   : > { %p1269_p8 = scmp.ne.s32.totalorder %s1609_s22, %s1268_s7 }
 0x12f   : > { %p1270_p9 = pnand %p1269_p8, %p1491_p7 }
 0x131   : > { %p1271_p11 = pneg %p1270_p9 }
 0x192   : > { %v310_v13 = vpop.permute.xlu0 %309 }
 0x193   : > { %v316_v14 = vsel %vm311_vm3, %v310_v13, 0 }
 0x194   : > { %1010 = vmatpush3.bf16.xpose.msra.mxu1 %v316_v14 }
 0x195   : > { %1021 = vmatprep.subr.bf16.mxu1 %v1359_v0  ;;  %v423_v16 = vpop.permute.xlu1 %422 }
 0x196   : > { %v425_v15 = vpop.permute.xlu0 %424 }
 0x197   : > { %v430_v17 = vsel %vm311_vm3, %v425_v15, 0 }
 0x199   : > { %v535_v18 = vpop.permute.xlu1 %534 }
 0x19a   : > { %v540_v19 = vsel %vm311_vm3, %v535_v18, 0  ;;  %v533_v21 = vpop.permute.xlu0 %532 }
 0x19b   : > { %1012 = vmatmul.mubr.msk.bf16.vlgmr.msra.gmra.mxu1 %vm311_vm3, %v304_v11 }
 0x19c   : > { %1022 = vmatpush3.bf16.xpose.msra.mxu1 %v430_v17  ;;  %1023 = vmatprep.mubr.msk.bf16.mxu1 %vm1360_vm0, %v1359_v0 }
 0x19d   : > { %1033 = vmatprep.subr.bf16.mxu1 %v1359_v0  ;;  %v645_v20 = vpop.permute.xlu1 %644 }
 0x19e   : > { %v650_v22 = vsel %vm311_vm3, %v645_v20, 0  ;;  %v643_v23 = vpop.permute.xlu0 %642 }
 0x1a3   : > { %1024 = vmatmul.mubr.msk.bf16.vlgmr.msra.gmra.mxu1 %vm311_vm3, %v423_v16 }
 0x1a4   : > { %1034 = vmatpush3.bf16.xpose.msra.mxu1 %v540_v19  ;;  %1035 = vmatprep.mubr.msk.bf16.mxu1 %vm1360_vm0, %v1359_v0 }
 0x1a5   : > { %1045 = vmatprep.subr.bf16.mxu1 %v1359_v0 }
 0x1ab   : > { %1036 = vmatmul.mubr.msk.bf16.vlgmr.msra.gmra.mxu1 %vm311_vm3, %v533_v21 }
 0x1ac   : > { %1046 = vmatpush3.bf16.xpose.msra.mxu1 %v650_v22  ;;  %1047 = vmatprep.mubr.msk.bf16.mxu1 %vm1360_vm0, %v1359_v0 }
 0x1ad   : > { %1057 = vmatprep.subr.bf16.mxu1 %v1359_v0 }
 0x1b3   : > { %1048 = vmatmul.mubr.msk.bf16.vlgmr.msra.gmra.mxu1 %vm311_vm3, %v643_v23 }
 0x1b4   : > { %1061 = vmatprep.mubr.msk.bf16.mxu1 %vm1360_vm0, %v1359_v0 }
 0x25b   : > { %v352_v24 = vpop.f32.mrf.mxu1 }
 0x25c   : > { %v358_v25 = vsel %vm311_vm3, %v352_v24, -inf }
 0x25d   : > { %359 = vmax.xlane.f32.xlu1 %v358_v25  ;;  %v1013_v26 = vpop.f32.mrf.mxu1 }
 0x25f   : > { %v355_v27 = vpop.f32.mrf.mxu1 }
 0x261   : > { %v1014_v28 = vpop.f32.mrf.mxu1 }
 0x263   : > { %v466_v29 = vpop.f32.mrf.mxu1 }
 0x264   : > { %v472_v30 = vsel %vm311_vm3, %v466_v29, -inf }
 0x265   : > { %473 = vmax.xlane.f32.xlu0 %v472_v30  ;;  %v1025_v31 = vpop.f32.mrf.mxu1 }
 0x267   : > { %v469_v32 = vpop.f32.mrf.mxu1 }
 0x269   : > { %v1026_v33 = vpop.f32.mrf.mxu1 }
 0x26a   : > { %v1170_v33 = vld [vmem:[#allocation8 + $0x8] sm:$0xff]  }
 0x26b   : > { %v576_v34 = vpop.f32.mrf.mxu1  ;;  %1058 = vmatpush3.bf16.msra.mxu1 %v1170_v33 }
 0x26c   : > { %v582_v35 = vsel %vm311_vm3, %v576_v34, -inf  ;;  %1059 = vmatprep.subr.bf16.mxu1 %v1359_v0 }
 0x26d   : > { %583 = vmax.xlane.f32.xlu0 %v582_v35  ;;  %v1037_v36 = vpop.f32.mrf.mxu1 }
 0x26f   : > { %v579_v37 = vpop.f32.mrf.mxu1 }
 0x271   : > { %v1038_v38 = vpop.f32.mrf.mxu1 }
 0x273   : > { %v686_v39 = vpop.f32.mrf.mxu1 }
 0x274   : > { %v692_v40 = vsel %vm311_vm3, %v686_v39, -inf }
 0x275   : > { %693 = vmax.xlane.f32.xlu1 %v692_v40  ;;  %v1049_v41 = vpop.f32.mrf.mxu1 }
 0x277   : > { %v689_v42 = vpop.f32.mrf.mxu1 }
 0x279   : > { %v1050_v43 = vpop.f32.mrf.mxu1 }
 0x2e6   : > { %v360_v44 = vpop.xlane.xlu1 %359 }
 0x2e7   : > { %v361_v45 = vsub.f32 %v352_v24, %v360_v44 }
 0x2e9   : > { %v362_v46 = vmul.f32 1.442695, %v361_v45 }
 0x2eb   : > { %1172 = vpow2.f32 %v362_v46 }
 0x2ee   : > { %v474_v47 = vpop.xlane.xlu0 %473 }
 0x2ef   : > { %v475_v48 = vsub.f32 %v466_v29, %v474_v47 }
 0x2f1   : > { %v476_v49 = vmul.f32 1.442695, %v475_v48 }
 0x2f3   : > { %1174 = vpow2.f32 %v476_v49 }
 0x2f6   : > { %v584_v50 = vpop.xlane.xlu0 %583 }
 0x2f7   : > { %v585_v51 = vsub.f32 %v576_v34, %v584_v50  ;;  %v1171_v34 = vld [vmem:[#allocation8] sm:$0xff]  }
 0x2f8   : > { %v1173_v52 = vpop.eup %1172  ;;  %1060 = vmatpush3.bf16.msra.mxu1 %v1171_v34 }
 0x2f9   : > { %v586_v53 = vmul.f32 1.442695, %v585_v51  ;;  %v364_v54 = vsel %vm311_vm3, %v1173_v52, 0.0 }
 0x2fa   : > { %365 = vadd.xlane.f32.xlu0 %v364_v54 }
 0x2fb   : > { %1176 = vpow2.f32 %v586_v53 }
 0x2fe   : > { %v694_v59 = vpop.xlane.xlu1 %693 }
 0x2ff   : > { %v695_v60 = vsub.f32 %v686_v39, %v694_v59 }
 0x300   : > { %v1175_v55 = vpop.eup %1174 }
 0x301   : > { %v478_v56 = vsel %vm311_vm3, %v1175_v55, 0.0  ;;  %v696_v61 = vmul.f32 1.442695, %v695_v60 }
 0x302   : > { %479 = vadd.xlane.f32.xlu1 %v478_v56 }
 0x303   : > { %1178 = vpow2.f32 %v696_v61 }
 0x308   : > { %v1177_v57 = vpop.eup %1176 }
 0x309   : > { %v588_v58 = vsel %vm311_vm3, %v1177_v57, 0.0 }
 0x30a   : > { %589 = vadd.xlane.f32.xlu0 %v588_v58 }
 0x310   : > { %v1179_v62 = vpop.eup %1178 }
 0x311   : > { %v698_v63 = vsel %vm311_vm3, %v1179_v62, 0.0 }
 0x313   : > { %484 = vrot.lane.b32.xlu1 %v1543_v10, %s1368_s21  ;;  %s1274_s21 = scalar_lea.vmem %s1273_s27, 256 }
 0x314   : > { %p1276_p13 = scmp.lt.s32.totalorder %s1274_s21, %s1268_s7 }
 0x316   : > { %p1277_p0 = por %p1276_p13, %p1275_p2 }
 0x318   : > { %p1278_p5 = pnand %p1277_p0, %p1271_p11 }
 0x320   : > { %370 = vrot.lane.b32.xlu0 %v1543_v10, %s1369_s8 }
 0x324   : > { %704 = vrot.lane.b32.xlu0 %v1543_v10, %s1370_s9 }
 0x337   : > { %699 = vadd.xlane.f32.xlu1 %v698_v63 }
 0x348   : > { %594 = vrot.lane.b32.xlu1 %v1543_v10, %s1371_s10 }
 0x383   : > { %v366_v1 = vpop.xlane.xlu0 %365 }
 0x384   : > { %1180 = vrcp.f32 %v366_v1 }
 0x38b   : > { %v480_v2 = vpop.xlane.xlu1 %479 }
 0x38c   : > { %1182 = vrcp.f32 %v480_v2 }
 0x38f   : > { %v485_v8 = vpop.permute.xlu1 %484 }
 0x390   : > { %v490_v12 = vsel %vm375_vm4, %v485_v8, 0 }
 0x391   : > { %v1181_v3 = vpop.eup %1180 }
 0x392   : > { %v368_v5 = vmul.f32 %v1181_v3, %v1173_v52 }
 0x393   : > { %v590_v4 = vpop.xlane.xlu0 %589 }
 0x394   : > { %v369_v9 = vpack.c.bf16 %v368_v5, %v368_v5  ;;  %1184 = vrcp.f32 %v590_v4 }
 0x397   : > { %v371_v6 = vpop.permute.xlu0 %370 }
 0x398   : > { %v377_v7 = vsel %vm375_vm4, %v371_v6, 0 }
 0x399   : > { %1016 = vmatpush3.bf16.msra.mxu0 %v377_v7  ;;  %v1183_v11 = vpop.eup %1182 }
 0x39a   : > { %1027 = vmatprep.subr.bf16.mxu0 %v1359_v0  ;;  %v482_v10 = vmul.f32 %v1183_v11, %v1175_v55 }
 0x39b   : > { %v705_v19 = vpop.permute.xlu0 %704 }
 0x39c   : > { %1018 = vmatmul.mubr.msk.bf16.vlgmr.msra.gmra.mxu0 %vm311_vm3, %v369_v9  ;;  %v483_v13 = vpack.c.bf16 %v482_v10, %v482_v10  ;;  %v710_v21 = vsel %vm375_vm4, %v705_v19, 0 }
 0x39d   : > { %1028 = vmatpush3.bf16.msra.mxu0 %v490_v12  ;;  %1029 = vmatprep.mubr.msk.bf16.mxu0 %vm1360_vm0, %v1359_v0 }
 0x39e   : > { %1039 = vmatprep.subr.bf16.mxu0 %v1359_v0 }
 0x3a1   : > { %v1185_v14 = vpop.eup %1184 }
 0x3a2   : > { %v592_v16 = vmul.f32 %v1185_v14, %v1177_v57 }
 0x3a4   : > { %1030 = vmatmul.mubr.msk.bf16.vlgmr.msra.gmra.mxu0 %vm311_vm3, %v483_v13  ;;  %v593_v20 = vpack.c.bf16 %v592_v16, %v592_v16 }
 0x3a5   : > { %1041 = vmatprep.mubr.msk.bf16.mxu0 %vm1360_vm0, %v1359_v0 }
 0x3c0   : > { %v700_v15 = vpop.xlane.xlu1 %699 }
 0x3c1   : > { %1186 = vrcp.f32 %v700_v15 }
 0x3c4   : > { %v595_v17 = vpop.permute.xlu1 %594 }
 0x3c5   : > { %v600_v18 = vsel %vm375_vm4, %v595_v17, 0 }
 0x3c6   : > { %1040 = vmatpush3.bf16.msra.mxu0 %v600_v18 }
 0x3c7   : > { %1051 = vmatprep.subr.bf16.mxu0 %v1359_v0 }
 0x3c9   : > { %1042 = vmatmul.mubr.msk.bf16.vlgmr.msra.gmra.mxu0 %vm311_vm3, %v593_v20 }
 0x3ca   : > { %1052 = vmatpush3.bf16.msra.mxu0 %v710_v21  ;;  %1053 = vmatprep.mubr.msk.bf16.mxu0 %vm1360_vm0, %v1359_v0 }
 0x3ce   : > { %v1187_v22 = vpop.eup %1186 }
 0x3cf   : > { %v702_v23 = vmul.f32 %v1187_v22, %v1179_v62 }
 0x3d1   : > { %v703_v24 = vpack.c.bf16 %v702_v23, %v702_v23 }
 0x3d3   : > { %1054 = vmatmul.mubr.msk.bf16.vlgmr.msra.gmra.mxu0 %vm311_vm3, %v703_v24 }
 0x45c   : > { %v413_v25 = vpop.f32.mrf.mxu0 }
 0x45e   : > { %v1019_v26 = vpop.f32.mrf.mxu0 }
 0x460   : > { %v416_v27 = vpop.f32.mrf.mxu0 }
 0x462   : > { %v1020_v28 = vpop.f32.mrf.mxu0 }
 0x464   : > { %v526_v29 = vpop.f32.mrf.mxu0 }
 0x465   : > { %753 = vrot.lane.b32.xlu1 %v526_v29, %s1372_s18 }
 0x466   : > { %v1031_v30 = vpop.f32.mrf.mxu0 }
 0x468   : > { %v529_v31 = vpop.f32.mrf.mxu0 }
 0x46a   : > { %v1032_v32 = vpop.f32.mrf.mxu0 }
 0x489   : > { %v636_v35 = vpop.f32.mrf.mxu0 }
 0x48a   : > { %757 = vrot.lane.b32.xlu0 %v636_v35, %s1373_s25 }
 0x48b   : > { %v1043_v36 = vpop.f32.mrf.mxu0 }
 0x48d   : > { %v639_v37 = vpop.f32.mrf.mxu0 }
 0x48f   : > { %v1044_v38 = vpop.f32.mrf.mxu0 }
 0x493   : > { %v746_v39 = vpop.f32.mrf.mxu0 }
 0x494   : > { %761 = vrot.lane.b32.xlu1 %v746_v39, %s1374_s28 }
 0x495   : > { %v1055_v40 = vpop.f32.mrf.mxu0 }
 0x497   : > { %v749_v41 = vpop.f32.mrf.mxu0 }
 0x499   : > { %v1056_v42 = vpop.f32.mrf.mxu0 }
 0x4d7   : > { %v754_v43 = vpop.permute.xlu1 %753 }
 0x4d8   : > { %v764_v0 = vsel %vm311_vm3, %v413_v25, %v754_v43 }
 0x4fc   : > { %v758_v44 = vpop.permute.xlu0 %757 }
 0x4fd   : > { %v766_v45 = vsel %vm765_vm5, %v764_v0, %v758_v44 }
 0x506   : > { %v762_v46 = vpop.permute.xlu1 %761 }
 0x507   : > { %v768_v47 = vsel %vm767_vm6, %v766_v45, %v762_v46 }
 0x508   : > { %v769_v48 = vpack.c.bf16 %v768_v47, %v768_v47 }
 0x50a   : > { %1062 = vmatmul.mubr.msk.bf16.vlgmr.msra.gmra.mxu1 %vm252_vm1, %v769_v48 }
 0x5ca   : > { %v824_v49 = vpop.f32.mrf.mxu1 }
 0x5cb   : > { %830 = vst.msk [vmem:[%s228_s20] sm:$0xff] %vm252_vm1, %v824_v49 }
 0x5cc   : > { %v1063_v50 = vpop.f32.mrf.mxu1 }
 0x5cd   : > { %1281 = shalt.err (!%p1278_p5)
}
 0x5ce   : > { %s1282_s8 = scalar_lea.hbm %s1607_s5, 128  ;;  %s1286_s10 = scalar_lea.hbm %s1659_s3, 256 }
 0x5cf   : > { %p1283_p10 = scmp.ne.s32.totalorder %s1607_s5, %s1282_s8  ;;  %p1287_p6 = scmp.lt.s32.totalorder %s1607_s5, %s1659_s3 }
 0x5d0   : > { %p1288_p12 = scmp.lt.s32.totalorder %s1286_s10, %s1282_s8 }
 0x5d1   : > { %p1284_p1 = pnand %p1283_p10, %p1491_p7 }
 0x5d2   : > { %p1289_p3 = por %p1288_p12, %p1287_p6 }
 0x5d3   : > { %p1285_p4 = pneg %p1284_p1 }
 0x5d5   : > { %p1290_p8 = pnand %p1289_p3, %p1285_p4 }
 0x5d7   : > { %1293 = shalt.err (!%p1290_p8)
}
 0x5d8   : > { %1075 = dma.vmem_to_hbm [thread:$0]  (%p1491_p7), %s1609_s22, 128, %s1607_s5, %s832_s6   ;;  %v827_v51 = vpop.f32.mrf.mxu1 }
 0x5da   : > { %v1064_v52 = vpop.f32.mrf.mxu1 }
 0x5db PF: > { %s858_s28 = sand.u32 1, %s1332_s12   ;;  %p1673_p9 = scmp.ne.s32.totalorder %s1666_s23, 0 }
 0x5dc   : > { %p1674_p11 = scmp.ge.s32.totalorder %s1352_s17, 2  ;;  %s859_s30 = scalar_lea.sflag [#allocation5], %s858_s28 }
 0x5de   : > { %p1089_p2 = pnand %p1674_p11, %p1673_p9 }
 0x5e0   : > { %p1090_p13 = pneg %p1089_p2 }
 0x5e2   : > { %1327 = dma.done.wait (%p1090_p13), %s859_s30, 128  }
 0x5e3   : > { %1329 = vsyncadd (%p1090_p13), %s859_s30, 4294967168  ;;  %s20_s17 = sadd.s32 1, %s1352_s17   ;;  %s1675_s12 = smov %s1336_s13 }
 0x5e4   : > { %p17_p0 = scmp.ge.s32.totalorder %s20_s17, 4   ;;  %s1676_s13 = smov %s1340_s14 }
 0x5e5   : > { %s1677_s14 = smov %s1500_s29  ;;  %s1678_s15 = smov %s1348_s16 }
 0x5e6   : > { %s1679_s16 = smov %s1681_s11  ;;  %19 = sbr.rel (!%p17_p0) target bundleno = 7 (0x7), region = 90 }
 0x5eb   :  { %864 = vsyncpa [#allocation4], 1 }
 0x5ec   :  { %866 = vsyncpa [#allocation4 + $0x1], 1 }
 0x5ed   :  { %867 = vsyncpa [#allocation7], 1 }
 0x5ee   :  { %868 = vsyncpa [#allocation5], 1 }
 0x5ef   :  { %870 = vsyncpa [#allocation5 + $0x1], 1 }

</bundles_post_ra>
